<compile_context>
chip_gen: v7x
topology: tpu7x:2x2x1
jax: 0.10.0
libtpu: 0.0.40
codegen_flags: <defaults>
</compile_context>

<pallas_src>
import jax
import jax.numpy as jnp
import numpy as np
from jax.experimental import pallas as pl
from jax.experimental.pallas import tpu as pltpu


def _pick_tb(batch, length, channels, itemsize, target_bytes=2 << 20):
    """Batch elements per grid step: divisor of B, ~target-sized blocks,
    and >= 2 grid steps when B >= 2 (v7x has 2 TensorCores)."""
    per_batch = max(length * channels * itemsize, 1)
    cap = max(1, target_bytes // per_batch)
    if batch >= 2:
        cap = min(cap, max(1, batch // 2))
    tb = 1
    for d in range(1, batch + 1):
        if batch % d == 0 and d <= cap:
            tb = d
    return tb


def _pick_chunk(tb, length, channels, target_bytes=512 << 10):
    """Chunk size along L for the in-kernel loops (bounds vreg pressure)."""
    per_l = max(tb * channels * 4, 1)          # f32 compute footprint per row of L
    chunk = max(8, target_bytes // per_l)
    chunk = (chunk // 8) * 8                   # keep sublane-aligned chunks
    return min(length, max(chunk, 1))


def _make_se_kernel(length, chunk):
    n_full = length // chunk
    rem = length - n_full * chunk
    inv_l = 1.0 / float(length)
    single_pass = (n_full == 1 and rem == 0)

    def kernel(x_ref, w1t_ref, w2t_ref, o_ref):
        # x_ref / o_ref: (TB, L, C)  (lane dim = C, full width stores)
        tb = x_ref.shape[0]
        c = x_ref.shape[2]

        # ---- pass 1: mean over L (accumulate in f32), chunked over L ----
        def _chunk_sum(start, size):
            xi = x_ref[:, pl.ds(start, size), :]
            return jnp.sum(xi.astype(jnp.float32), axis=1)      # (TB, C)

        if single_pass:
            acc = _chunk_sum(0, length)
        else:
            def sum_body(i, a):
                start = pl.multiple_of(i * chunk, chunk)
                return a + _chunk_sum(start, chunk)
            acc = jax.lax.fori_loop(0, n_full, sum_body,
                                    jnp.zeros((tb, c), jnp.float32),
                                    unroll=n_full <= 8)
            if rem:
                acc = acc + _chunk_sum(n_full * chunk, rem)

        y = acc * inv_l                                          # (TB, C)

        # ---- excitation MLP: sigmoid(relu(y @ W1.T) @ W2.T) ----
        h = jnp.dot(y, w1t_ref[...], preferred_element_type=jnp.float32)
        h = jnp.maximum(h, 0.0)
        s = jnp.dot(h, w2t_ref[...], preferred_element_type=jnp.float32)
        s = jax.nn.sigmoid(s)                                    # (TB, C)

        # Final multiply/store in the I/O dtype (bf16 stays bf16 on v6e/v7x;
        # f32 inputs keep f32 compute, which is what v5e needs).
        s = s.astype(o_ref.dtype)[:, None, :]                    # (TB, 1, C)

        # ---- pass 2: scale + store, chunked (re-read x_ref from VMEM) ----
        def _scale_store(start, size):
            xi = x_ref[:, pl.ds(start, size), :]
            o_ref[:, pl.ds(start, size), :] = xi.astype(o_ref.dtype) * s

        if single_pass:
            _scale_store(0, length)
        else:
            def scale_body(i, carry):
                start = pl.multiple_of(i * chunk, chunk)
                _scale_store(start, chunk)
                return carry
            jax.lax.fori_loop(0, n_full, scale_body, 0, unroll=n_full <= 8)
            if rem:
                _scale_store(n_full * chunk, rem)

    return kernel


def se_layer(x, w1, w2):
    """x: (B, C, L); w1: (H, C); w2: (C, H)  (PyTorch Linear weight layout)."""
    B, C, L = x.shape
    H = w1.shape[0]
    assert w1.shape == (H, C) and w2.shape == (C, H)

    w1t = jnp.asarray(w1).T                     # (C, H)
    w2t = jnp.asarray(w2).T                     # (H, C)

    # Lane-dense layout: channels last so the output minor dim is C.
    x_t = jnp.transpose(x, (0, 2, 1))           # (B, L, C)

    itemsize = jnp.dtype(x.dtype).itemsize
    tb = _pick_tb(B, L, C, itemsize)
    grid = (B // tb,)
    chunk = _pick_chunk(tb, L, C)

    block_bytes = tb * L * C * itemsize
    # Double-buffered in + out blocks + weights + headroom; cap for v7x (64 MiB).
    vmem_need = 4 * block_bytes + 8 * C * H + (2 << 20)
    vmem_limit = min(max(vmem_need, 16 << 20), 48 << 20)

    flops = 2 * B * C * L + 4 * B * C * H
    bytes_accessed = 2 * B * C * L * itemsize + 2 * C * H * 4

    out_t = pl.pallas_call(
        _make_se_kernel(L, chunk),
        out_shape=jax.ShapeDtypeStruct((B, L, C), x.dtype),
        grid_spec=pl.GridSpec(
            grid=grid,
            in_specs=[
                pl.BlockSpec((tb, L, C), lambda b: (b, 0, 0)),
                pl.BlockSpec((C, H), lambda b: (0, 0)),   # weights DMA'd once
                pl.BlockSpec((H, C), lambda b: (0, 0)),
            ],
            out_specs=pl.BlockSpec((tb, L, C), lambda b: (b, 0, 0)),
        ),
        compiler_params=pltpu.CompilerParams(
            dimension_semantics=("parallel",),
            vmem_limit_bytes=vmem_limit,
        ),
        cost_estimate=pl.CostEstimate(
            flops=flops, transcendentals=B * C, bytes_accessed=bytes_accessed),
        input_output_aliases={0: 0},            # scale the transposed temp in place
    )(x_t, w1t, w2t)

    return jnp.transpose(out_t, (0, 2, 1))      # back to (B, C, L)


def se_layer_ref(x, w1, w2):
    y = jnp.mean(x, axis=-1)                    # (B, C)
    h = jnp.maximum(y @ w1.T, 0.0)              # (B, H)
    s = jax.nn.sigmoid(h @ w2.T)                # (B, C)
    return x * s[:, :, None]


if __name__ == "__main__":
    def run_case(key, B, C, L, reduction):
        H = C // reduction
        kx, k1, k2 = jax.random.split(key, 3)
        x = jax.random.normal(kx, (B, C, L), dtype=jnp.float32)
        w1 = jax.random.uniform(k1, (H, C), jnp.float32,
                                -1.0 / np.sqrt(C), 1.0 / np.sqrt(C))
        w2 = jax.random.uniform(k2, (C, H), jnp.float32,
                                -1.0 / np.sqrt(H), 1.0 / np.sqrt(H))
        out = jax.block_until_ready(se_layer(x, w1, w2))
        ref = se_layer_ref(x, w1, w2)
        np.testing.assert_allclose(np.asarray(out), np.asarray(ref),
                                   rtol=1e-5, atol=1e-5)

    root = jax.random.PRNGKey(0)
    k_small, k_large = jax.random.split(root)
    # TB=2, grid=(2,), single-chunk path.
    run_case(k_small, B=4, C=128, L=64, reduction=16)
    # TB=2, grid=(2,), chunked-L path inside the kernel (chunk=512, 4 chunks).
    run_case(k_large, B=4, C=128, L=2048, reduction=16)
    print("KERNEL_OK")
</pallas_src>

<mosaic_0001>
module attributes {stable_mosaic.version = 11 : i64} {
  func.func @kernel(%arg0: i32, %arg1: memref<2x64x128xf32, #tpu.memory_space<vmem>>, %arg2: memref<128x8xf32, #tpu.memory_space<vmem>>, %arg3: memref<8x128xf32, #tpu.memory_space<vmem>>, %arg4: memref<2x64x128xf32, #tpu.memory_space<vmem>>) attributes {dimension_semantics = [#tpu.dimension_semantics<parallel>], iteration_bounds = array<i64: 2>, scalar_prefetch = 0 : i64, scratch_operands = 0 : i64, tpu.core_type = #tpu.core_type<tc>, window_params = [{transform_indices = @transform_0, window_bounds = array<i64: 2, 64, 128>}, {pipeline_mode = #tpu.pipeline_mode<synchronous>, transform_indices = @transform_1, window_bounds = array<i64: 128, 8>}, {pipeline_mode = #tpu.pipeline_mode<synchronous>, transform_indices = @transform_2, window_bounds = array<i64: 8, 128>}, {transform_indices = @transform_3, window_bounds = array<i64: 2, 64, 128>}]} {
    %c0 = arith.constant 0 : index
    %c0_0 = arith.constant 0 : index
    %c0_1 = arith.constant 0 : index
    %0 = vector.load %arg1[%c0, %c0_0, %c0_1] : memref<2x64x128xf32, #tpu.memory_space<vmem>>, vector<2x64x128xf32>
    %cst = arith.constant dense<0.000000e+00> : vector<2x128xf32>
    %1 = vector.multi_reduction <add>, %0, %cst [1] : vector<2x64x128xf32> to vector<2x128xf32>
    %cst_2 = arith.constant 1.562500e-02 : f32
    %2 = vector.broadcast %cst_2 : f32 to vector<2x128xf32>
    %3 = arith.mulf %1, %2 : vector<2x128xf32>
    %c0_3 = arith.constant 0 : index
    %c0_4 = arith.constant 0 : index
    %4 = vector.load %arg2[%c0_3, %c0_4] : memref<128x8xf32, #tpu.memory_space<vmem>>, vector<128x8xf32>
    %cst_5 = arith.constant dense<0.000000e+00> : vector<2x8xf32>
    %5 = tpu.matmul %3, %4, %cst_5 {dimension_numbers = #tpu.dot_dimension_numbers<[1], [0], [0], [1], [0, 0, 1, 1], [], []>} : vector<2x128xf32>, vector<128x8xf32>, vector<2x8xf32> -> vector<2x8xf32>
    %cst_6 = arith.constant 0.000000e+00 : f32
    %6 = vector.broadcast %cst_6 : f32 to vector<2x8xf32>
    %7 = arith.maximumf %5, %6 : vector<2x8xf32>
    %c0_7 = arith.constant 0 : index
    %c0_8 = arith.constant 0 : index
    %8 = vector.load %arg3[%c0_7, %c0_8] : memref<8x128xf32, #tpu.memory_space<vmem>>, vector<8x128xf32>
    %cst_9 = arith.constant dense<0.000000e+00> : vector<2x128xf32>
    %9 = tpu.matmul %7, %8, %cst_9 {dimension_numbers = #tpu.dot_dimension_numbers<[1], [0], [0], [1], [0, 0, 1, 1], [], []>} : vector<2x8xf32>, vector<8x128xf32>, vector<2x128xf32> -> vector<2x128xf32>
    %10 = arith.negf %9 : vector<2x128xf32>
    %11 = math.exp %10 : vector<2x128xf32>
    %cst_10 = arith.constant 1.000000e+00 : f32
    %12 = vector.broadcast %cst_10 : f32 to vector<2x128xf32>
    %13 = arith.addf %12, %11 : vector<2x128xf32>
    %14 = arith.divf %12, %13 : vector<2x128xf32>
    %15 = vector.shape_cast %14 : vector<2x128xf32> to vector<2x1x128xf32>
    %c0_11 = arith.constant 0 : index
    %c0_12 = arith.constant 0 : index
    %c0_13 = arith.constant 0 : index
    %16 = vector.load %arg1[%c0_11, %c0_12, %c0_13] : memref<2x64x128xf32, #tpu.memory_space<vmem>>, vector<2x64x128xf32>
    %17 = vector.broadcast %15 : vector<2x1x128xf32> to vector<2x64x128xf32>
    %18 = arith.mulf %16, %17 : vector<2x64x128xf32>
    %c0_14 = arith.constant 0 : index
    %c0_15 = arith.constant 0 : index
    %c0_16 = arith.constant 0 : index
    %19 = vector.load %arg4[%c0_14, %c0_15, %c0_16] : memref<2x64x128xf32, #tpu.memory_space<vmem>>, vector<2x64x128xf32>
    tpu.vector_store %arg4[%c0_14, %c0_15, %c0_16], %18 {strides = array<i32>} : memref<2x64x128xf32, #tpu.memory_space<vmem>>, vector<2x64x128xf32>,
    return
  }
  func.func @transform_0(%arg0: i32) -> (i32, i32, i32) {
    %c0_i32 = arith.constant 0 : i32
    %c0_i32_0 = arith.constant 0 : i32
    %c0_i32_1 = arith.constant 0 : i32
    return %arg0, %c0_i32, %c0_i32_0 : i32, i32, i32
  }
  func.func @transform_1(%arg0: i32) -> (i32, i32) {
    %c0_i32 = arith.constant 0 : i32
    %c0_i32_0 = arith.constant 0 : i32
    %c0_i32_1 = arith.constant 0 : i32
    return %c0_i32, %c0_i32_0 : i32, i32
  }
  func.func @transform_2(%arg0: i32) -> (i32, i32) {
    %c0_i32 = arith.constant 0 : i32
    %c0_i32_0 = arith.constant 0 : i32
    %c0_i32_1 = arith.constant 0 : i32
    return %c0_i32, %c0_i32_0 : i32, i32
  }
  func.func @transform_3(%arg0: i32) -> (i32, i32, i32) {
    %c0_i32 = arith.constant 0 : i32
    %c0_i32_0 = arith.constant 0 : i32
    %c0_i32_1 = arith.constant 0 : i32
    return %arg0, %c0_i32, %c0_i32_0 : i32, i32, i32
  }
}

</mosaic_0001>

<bundles_post_ra>
// kernel: tpu_custom_call.1
= control target key start
LH: loop header
LB: loop body
LE: loop exit
PB: predicated region body
PF: predicated region fallthrough
CT: control target
= control target key end

     0   :  { %8 = vsyncpa [#allocation3], 0  ;;  %s1179_s0 = inlined_call_operand.hbm [shape: f32[4,64,128], index: 0, kind: input, shape index: {}, may-alias: {0,3}]   ;;  %s1180_s1 = inlined_call_operand.vmem [shape: f32[128,8], index: 1, kind: input, shape index: {}]   ;;  %s1181_s2 = inlined_call_operand.vmem [shape: f32[8,128], index: 2, kind: input, shape index: {}]   ;;  %s1182_s3 = inlined_call_operand.hbm [shape: f32[4,64,128], index: 3, kind: output, shape index: {}, may-alias: {0,3}]  }
   0x1   :  { %10 = vsyncpa [#allocation3 + $0x1], 0 }
   0x2   :  { %11 = vsyncpa [#allocation4], 0 }
   0x3   :  { %13 = vsyncpa [#allocation4 + $0x1], 0  ;;  %s853_s12 = smov 0   ;;  %s855_s13 = smov 0  }
   0x4   :  { %s857_s14 = smov 0   ;;  %s859_s15 = smov 0  }
   0x5 LB: > { %s874_s16 = sadd.s32 4294967295, %s821_s15   ;;  %s562_s17 = sadd.s32 4294967294, %s821_s15   ;;  %s821_s15 = sphi %s859_s15, %s1195_s15   ;;  %s817_s14 = sphi %s857_s14, %s1194_s14   ;;  %s813_s13 = sphi %s855_s13, %s1193_s13   ;;  %s809_s12 = sphi %s853_s12, %s1192_s12  }
   0x6   : > { %s878_s18 = sadd.s32 1, %s821_s15   ;;  %s26_s19 = sadd.s32 1, %s817_s14 }
   0x7   : > { %s23_s20 = ssub.s32 %s821_s15, %s878_s18  ;;  %p33_p0 = scmp.ne.s32.totalorder %s817_s14, %s813_s13 }
   0x8   : > { %p24_p1 = scmp.eq.s32.totalorder %s23_s20, 0  ;;  %p34_p2 = scmp.eq.s32.totalorder %s821_s15, 0 }
   0x9   : > { %p39_p3 = scmp.ne.s32.totalorder %s813_s13, %s809_s12  ;;  %p40_p4 = scmp.eq.s32.totalorder %s874_s16, 0 }
   0xa   : > { %s890_s21 = scalar_select %p24_p1, %s817_s14, %s26_s19  }
   0xb   : > { %p892_p5 = por %p34_p2, %p33_p0  ;;  %p896_p6 = por %p40_p4, %p39_p3 }
   0xc   : > { %p105_p7 = scmp.eq.s32.totalorder %s874_s16, 1  ;;  %p111_p8 = scmp.eq.s32.totalorder %s562_s17, 1 }
   0xd   : > { %p679_p10 = scmp.lt.s32.totalorder %s821_s15, 2  ;;  %s137_s26 = sand.u32 1, %s817_s14  }
   0xe   : > { %p903_p11 = por %p105_p7, %p33_p0  ;;  %p907_p12 = por %p111_p8, %p39_p3 }
   0xf   : > { %s581_s27 = sshll.u32 %s821_s15, 11  ;;  %s565_s28 = sshll.u32 %s137_s26, 7 }
  0x10   : > { %s1186_s24 = scalar_select %p903_p11, 1, 0 }
  0x11   : > { %s1187_s25 = scalar_select %p907_p12, 1, 0 }
  0x12   : > { %s916_s4 = scalar_lea.hbm %s1179_s0, %s581_s27  ;;  %s141_s5 = scalar_lea.vmem [#allocation2], %s565_s28 }
  0x13   : > { %s149_s6 = sshll.u32 %s141_s5, 4  ;;  %p920_p13 = pnand %p679_p10, %p892_p5  ;;  %s924_s6 = int_to_ptr.vmem [resolvable:$true] %s149_s6 }
  0x14   : > { %s926_s8 = scalar_lea.sflag [#allocation3], %s137_s26  ;;  %s725_s9 = scalar_lea.hbm %s916_s4, 2048 }
  0x15   : > { %p726_p0 = scmp.ne.s32.totalorder %s916_s4, %s725_s9  ;;  %p727_p1 = pneg %p920_p13 }
  0x16   : > { %s730_s17 = scalar_lea.hbm %s1179_s0, 4096  ;;  %p731_p4 = scmp.lt.u32.totalorder %s916_s4, %s1179_s0 }
  0x17   : > { %p728_p2 = pnand %p727_p1, %p726_p0  ;;  %p732_p5 = scmp.lt.u32.totalorder %s730_s17, %s725_s9 }
  0x18   : > { %p734_p8 = scmp.lt.u32.totalorder %s725_s9, %s916_s4 }
  0x19   : > { %p729_p3 = pneg %p728_p2  ;;  %p733_p7 = por %p732_p5, %p731_p4 }
  0x1b   : > { %p735_p10 = por %p734_p8, %p733_p7 }
  0x1d   : > { %p736_p9 = pnand %p735_p10, %p729_p3 }
  0x1f   : > { %739 = shalt.err (!%p736_p9)
}
  0x20   : > { %s740_s22 = scalar_lea.vmem %s924_s6, 2048  ;;  %s823_s26 = smov [#allocation2]  }
  0x21   : > { %p741_p0 = scmp.ne.s32.totalorder %s924_s6, %s740_s22  ;;  %s745_s27 = sshll.u32 %s823_s26, 4  ;;  %s746_s27 = int_to_ptr.vmem [resolvable:$false] %s745_s27 }
  0x22   : > { %s747_s28 = scalar_lea.vmem %s746_s27, 4096  ;;  %p748_p11 = scmp.lt.s32.totalorder %s924_s6, %s746_s27 }
  0x23   : > { %p743_p2 = pnand %p741_p0, %p727_p1  ;;  %p749_p4 = scmp.lt.s32.totalorder %s747_s28, %s740_s22 }
  0x25   : > { %p744_p12 = pneg %p743_p2  ;;  %p750_p5 = por %p749_p4, %p748_p11 }
  0x27   : > { %p751_p7 = pnand %p750_p5, %p744_p12 }
  0x29   : > { %754 = shalt.err (!%p751_p7)
}
  0x2a   : > { %s824_s29 = smov 128   ;;  %s825_s30 = smov 8  }
  0x2b   : > { %674 = dma.hbm_to_vmem [thread:$0]  (!%p920_p13), %s916_s4, 2048, %s924_s6, %s926_s8, %s824_s29, %s824_s29, %s825_s30  }
  0x2c   : > { %p569_p9 = scmp.ge.s32.totalorder %s821_s15, 1  ;;  %p157_p1 = scmp.lt.s32.totalorder %s821_s15, 3 }
  0x2e   : > { %p158_p3 = pnand %p569_p9, %p157_p1 }
  0x2f   : > { %s957_s5 = sand.u32 (!%p158_p3), 1, %s813_s13  }
  0x30   : > { %161 = sbr.rel (%p158_p3) target bundleno = 573 (0x23d), region = 32  ;;  %s570_s9 = sshll.u32 (!%p158_p3), %s957_s5, 7 }
  0x31   : > { %s164_s10 = scalar_lea.sflag (!%p158_p3), [#allocation3], %s957_s5  ;;  %s963_s11 = scalar_lea.vmem (!%p158_p3), [#allocation2], %s570_s9 }
  0x37   : > { %800 = dma.done.wait (%p896_p6), %s164_s10, 2048  }
  0x38   : > { %802 = vsyncadd (%p896_p6), %s164_s10, 4294965248  ;;  %v826_v0 = vmov 0.0|0.0   ;;  %vm827_vm0 = vmmov 0   ;;  %v828_v1 = vmov 0.0   ;;  %v236_v2 = vld [vmem:[%s1180_s1] sm:$0xff]  ;;  %v237_v3 = vld [vmem:[%s1180_s1 + $0x8] sm:$0xff] }
  0x39   : > { %643 = vmatprep.subr.bf16.mxu0 %v826_v0  ;;  %635 = vmatprep.mubr.msk.f32.mxu0 %vm827_vm0, %v828_v1  ;;  %v238_v4 = vld [vmem:[%s1180_s1 + $0x10] sm:$0xff]  ;;  %v644_v5 = vpack.c.bf16 %v237_v3, %v236_v2  ;;  %v239_v6 = vld [vmem:[%s1180_s1 + $0x18] sm:$0xff]  ;;  %v240_v8 = vld [vmem:[%s1180_s1 + $0x20] sm:$0xff]  ;;  %vm254_vm1 = vcmask 1041409   ;;  %vm329_vm2 = vcmask 64512   ;;  %s583_s8 = sshll.u32 %s874_s16, 11 }
  0x3a   : > { %638 = vmatprep.subr.mxu1 %v828_v1  ;;  %640 = vmatprep.mubr.msk.f32.mxu1 %vm827_vm0, %v828_v1  ;;  %v647_v7 = vpack.c.bf16 %v239_v6, %v238_v4  ;;  %v241_v9 = vld [vmem:[%s1180_s1 + $0x28] sm:$0xff]  ;;  %v990_v10 = vld [vmem:[%s963_s11] sm:$0xff]  ;;  %v996_v12 = vld [vmem:[%s963_s11 + $0x10] sm:$0xff]  ;;  %s1098_s23 = scalar_lea.vmem [#allocation5], %s570_s9  ;;  %s1123_s19 = scalar_lea.hbm %s1182_s3, %s583_s8 }
  0x3b   : > { %645 = vmatpush3.bf16.msra.mxu0 %v644_v5  ;;  %v993_v11 = vld [vmem:[%s963_s11 + $0x8] sm:$0xff]  ;;  %v650_v14 = vpack.c.bf16 %v241_v9, %v240_v8  ;;  %v242_v15 = vld [vmem:[%s1180_s1 + $0x30] sm:$0xff]  ;;  %v243_v16 = vld [vmem:[%s1180_s1 + $0x38] sm:$0xff]  ;;  %s489_s17 = sshll.u32 %s1098_s23, 4  ;;  %s475_s20 = scalar_lea.sflag [#allocation4], %s957_s5  ;;  %s1125_s17 = int_to_ptr.vmem [resolvable:$true] %s489_s17 }
  0x3c   : > { %646 = vmatprep.subr.bf16.mxu0 %v826_v0  ;;  %v208_v13 = vadd.f32 %v993_v11, %v990_v10  ;;  %v1007_v17 = vld [vmem:[%s963_s11 + $0x18] sm:$0xff]  ;;  %v1011_v18 = vld [vmem:[%s963_s11 + $0x40] sm:$0xff]  ;;  %v1014_v19 = vld [vmem:[%s963_s11 + $0x48] sm:$0xff]  ;;  %v653_v26 = vpack.c.bf16 %v243_v16, %v242_v15  ;;  %s755_s22 = scalar_lea.vmem %s1125_s17, 2048  ;;  %p1189_p11 = scmp.ne.s32.totalorder %s1186_s24, 0 }
  0x3d   : > { %v1017_v20 = vld [vmem:[%s963_s11 + $0x50] sm:$0xff]  ;;  %v1021_v22 = vld [vmem:[%s963_s11 + $0x20] sm:$0xff]  ;;  %v221_v23 = vadd.f32 %v1014_v19, %v1011_v18  ;;  %v1026_v24 = vld [vmem:[%s963_s11 + $0x58] sm:$0xff]  ;;  %p756_p6 = scmp.ne.s32.totalorder %s1125_s17, %s755_s22  ;;  %s830_s26 = smov [#allocation5]  }
  0x3e   : > { %v209_v21 = vadd.f32 %v208_v13, %v996_v12  ;;  %v1030_v27 = vld [vmem:[%s963_s11 + $0x28] sm:$0xff]  ;;  %v244_v29 = vld [vmem:[%s1180_s1 + $0x40] sm:$0xff]  ;;  %v1045_v33 = vld [vmem:[%s963_s11 + $0x30] sm:$0xff]  ;;  %s759_s27 = sshll.u32 %s830_s26, 4  ;;  %s760_s27 = int_to_ptr.vmem [resolvable:$false] %s759_s27 }
  0x3f   : > { %648 = vmatpush3.bf16.msra.mxu0 %v647_v7  ;;  %v222_v28 = vadd.f32 %v221_v23, %v1017_v20  ;;  %v245_v30 = vld [vmem:[%s1180_s1 + $0x48] sm:$0xff]  ;;  %v1041_v31 = vld [vmem:[%s963_s11 + $0x60] sm:$0xff]  ;;  %v1053_v38 = vld [vmem:[%s963_s11 + $0x38] sm:$0xff]  ;;  %p757_p12 = pnand %p756_p6, %p1189_p11  ;;  %s761_s28 = scalar_lea.vmem %s760_s27, 4096 }
  0x40   : > { %649 = vmatprep.subr.bf16.mxu0 %v826_v0  ;;  %v210_v25 = vadd.f32 %v209_v21, %v1007_v17  ;;  %v1049_v35 = vld [vmem:[%s963_s11 + $0x68] sm:$0xff]  ;;  %v656_v37 = vpack.c.bf16 %v245_v30, %v244_v29  ;;  %v246_v40 = vld [vmem:[%s1180_s1 + $0x50] sm:$0xff]  ;;  %v247_v41 = vld [vmem:[%s1180_s1 + $0x58] sm:$0xff]  ;;  %p762_p8 = scmp.lt.s32.totalorder %s1125_s17, %s760_s27  ;;  %p763_p10 = scmp.lt.s32.totalorder %s761_s28, %s755_s22 }
  0x41   : > { %v223_v34 = vadd.f32 %v222_v28, %v1026_v24  ;;  %v1064_v42 = vld [vmem:[%s963_s11 + $0x70] sm:$0xff]  ;;  %v1069_v45 = vld [vmem:[%s963_s11 + $0x78] sm:$0xff]  ;;  %v659_v47 = vpack.c.bf16 %v247_v41, %v246_v40  ;;  %v248_v49 = vld [vmem:[%s1180_s1 + $0x60] sm:$0xff]  ;;  %v413_v28 = vlaneseq  ;;  %p758_p13 = pneg %p757_p12 }
  0x42   : > { %v211_v32 = vadd.f32 %v210_v25, %v1021_v22  ;;  %v249_v50 = vld [vmem:[%s1180_s1 + $0x68] sm:$0xff]  ;;  %v250_v56 = vld [vmem:[%s1180_s1 + $0x70] sm:$0xff]  ;;  %v251_v57 = vld [vmem:[%s1180_s1 + $0x78] sm:$0xff]  ;;  %v829_v25 = vmov 1966171168   ;;  %p764_p0 = por %p763_p10, %p762_p8 }
  0x43   : > { %651 = vmatpush3.bf16.msra.mxu0 %v650_v14  ;;  %v224_v39 = vadd.f32 %v223_v34, %v1041_v31  ;;  %v662_v54 = vpack.c.bf16 %v249_v50, %v248_v49  ;;  %v665_v61 = vpack.c.bf16 %v251_v57, %v250_v56  ;;  %v328_v8 = vld [vmem:[%s1181_s2] sm:$0xff]  ;;  %v414_v30 = vshrl.u32 %v413_v28, 7 }
  0x44   : > { %652 = vmatprep.subr.bf16.mxu0 %v826_v0  ;;  %v212_v36 = vadd.f32 %v211_v32, %v1030_v27  ;;  %639 = vmatpush3.msra.mxu1 %v328_v8  ;;  %p765_p2 = pnand %p764_p0, %p758_p13 }
  0x45   : > { %v225_v44 = vadd.f32 %v224_v39, %v1049_v35 }
  0x46   : > { %v213_v43 = vadd.f32 %v212_v36, %v1045_v33 }
  0x47   : > { %654 = vmatpush3.bf16.msra.mxu0 %v653_v26  ;;  %v226_v48 = vadd.f32 %v225_v44, %v1064_v42  ;;  %v411_v26 = vunpack.c.l.s4 %v829_v25 }
  0x48   : > { %655 = vmatprep.subr.bf16.mxu0 %v826_v0  ;;  %v214_v46 = vadd.f32 %v213_v43, %v1053_v38 }
  0x49   : > { %v227_v52 = vadd.f32 %v226_v48, %v1069_v45  ;;  %v412_v29 = vunpack.c.0.s8 %v411_v26 }
  0x4a   : > { %v215_v51 = vrot.slane %v214_v46, 4 }
  0x4b   : > { %657 = vmatpush3.bf16.msra.mxu0 %v656_v37  ;;  %v228_v55 = vrot.slane %v227_v52, 4  ;;  %v415_v32 = vsub.s32 %v412_v29, %v414_v30  ;;  %v434_v37 = vsub.s32 0, %v414_v30 }
  0x4c   : > { %658 = vmatprep.subr.bf16.mxu0 %v826_v0  ;;  %v216_v53 = vadd.f32 %v215_v51, %v214_v46 }
  0x4d   : > { %v229_v59 = vadd.f32 %v228_v55, %v227_v52 }
  0x4e   : > { %v217_v58 = vrot.slane %v216_v53, 2 }
  0x4f   : > { %660 = vmatpush3.bf16.msra.mxu0 %v659_v47  ;;  %v230_v62 = vrot.slane %v229_v59, 2 }
  0x50   : > { %661 = vmatprep.subr.bf16.mxu0 %v826_v0  ;;  %v218_v60 = vadd.f32 %v217_v58, %v216_v53 }
  0x51   : > { %v231_v1 = vadd.f32 %v230_v62, %v229_v59 }
  0x52   : > { %v219_v63 = vrot.slane %v218_v60, 1 }
  0x53   : > { %663 = vmatpush3.bf16.msra.mxu0 %v662_v54  ;;  %v232_v3 = vrot.slane %v231_v1, 1 }
  0x54   : > { %664 = vmatprep.subr.bf16.mxu0 %v826_v0  ;;  %v220_v2 = vadd.f32 %v219_v63, %v218_v60 }
  0x55   : > { %v233_v4 = vadd.f32 %v232_v3, %v231_v1 }
  0x56   : > { %v234_v5 = vmul.f32 0.015625, %v220_v2 }
  0x57   : > { %666 = vmatpush3.bf16.msra.mxu0 %v665_v61  ;;  %v235_v6 = vmul.f32 0.015625, %v233_v4 }
  0x59   : > { %v255_v7 = vsel %vm254_vm1, %v235_v6, %v234_v5 }
  0x5a   : > { %636 = vmatmul.mubr.f32.vlgmr.msra.gmra.mrb[0].mxu0 %v255_v7 }
 0x12d   : > { %v323_v9 = vpop.f32.mrb[0].mxu0 }
 0x12e   : > { %v327_v13 = vmax.f32 %v323_v9, 0.0  ;;  %v637_v0 = vpop.f32.mrb[1].mxu0 }
 0x130   : > { %641 = vmatmul.mubr.msk.f32.vlgmr.msra.gmra.mrb[0].mxu1 %vm329_vm2, %v327_v13 }
 0x203   : > { %v399_v14 = vpop.f32.mrb[0].mxu1 }
 0x204   : > { %v573_v15 = vmul.f32 -1.442695, %v399_v14  ;;  %v642_v16 = vpop.f32.mrb[1].mxu1 }
 0x206   : > { %721 = vpow2.f32 %v573_v15 }
 0x210   : > { %v722_v21 = vpop.eup %721 }
 0x211   : > { %v406_v23 = vadd.f32 1.0, %v722_v21 }
 0x213   : > { %723 = vrcp.f32 %v406_v23 }
 0x21d   : > { %v724_v34 = vpop.eup %723 }
 0x21e   : > { %v416_v36 = vrot.slane %v724_v34, %v415_v32 }
 0x220   : > { %v417_v39 = vcombine.high %v416_v36, %v416_v36  ;;  %v424_v40 = vrot.slane %v416_v36, %v415_v32 }
 0x222   : > { %v431_v41 = vrot.slane %v417_v39, %v415_v32  ;;  %v435_v43 = vrot.slane %v424_v40, %v434_v37 }
 0x224   : > { %v439_v44 = vrot.slane %v431_v41, %v434_v37  ;;  %v442_v46 = vmul.f32 %v435_v43, %v990_v10  ;;  %v443_v47 = vmul.f32 %v435_v43, %v993_v11  ;;  %v444_v48 = vmul.f32 %v435_v43, %v996_v12 }
 0x225   : > { %v445_v49 = vmul.f32 %v435_v43, %v1007_v17  ;;  %v446_v50 = vmul.f32 %v435_v43, %v1021_v22  ;;  %v447_v10 = vmul.f32 %v435_v43, %v1030_v27  ;;  %v448_v11 = vmul.f32 %v435_v43, %v1045_v33 }
 0x226   : > { %v449_v12 = vmul.f32 %v435_v43, %v1053_v38  ;;  %v450_v51 = vmul.f32 %v439_v44, %v1011_v18  ;;  %v451_v52 = vmul.f32 %v439_v44, %v1014_v19  ;;  %v452_v53 = vmul.f32 %v439_v44, %v1017_v20  ;;  %458 = vst [vmem:[%s1098_s23] sm:$0xff] %v442_v46 }
 0x227   : > { %459 = vst [vmem:[%s1098_s23 + $0x8] sm:$0xff] %v443_v47  ;;  %460 = vst [vmem:[%s1098_s23 + $0x10] sm:$0xff] %v444_v48  ;;  %v453_v17 = vmul.f32 %v439_v44, %v1026_v24  ;;  %v454_v22 = vmul.f32 %v439_v44, %v1041_v31  ;;  %v455_v18 = vmul.f32 %v439_v44, %v1049_v35 }
 0x228   : > { %v456_v19 = vmul.f32 %v439_v44, %v1064_v42  ;;  %461 = vst [vmem:[%s1098_s23 + $0x18] sm:$0xff] %v445_v49  ;;  %462 = vst [vmem:[%s1098_s23 + $0x20] sm:$0xff] %v446_v50  ;;  %v457_v20 = vmul.f32 %v439_v44, %v1069_v45 }
 0x229   : > { %463 = vst [vmem:[%s1098_s23 + $0x28] sm:$0xff] %v447_v10  ;;  %464 = vst [vmem:[%s1098_s23 + $0x30] sm:$0xff] %v448_v11 }
 0x22a   : > { %465 = vst [vmem:[%s1098_s23 + $0x38] sm:$0xff] %v449_v12  ;;  %466 = vst [vmem:[%s1098_s23 + $0x40] sm:$0xff] %v450_v51 }
 0x22b   : > { %467 = vst [vmem:[%s1098_s23 + $0x48] sm:$0xff] %v451_v52  ;;  %468 = vst [vmem:[%s1098_s23 + $0x50] sm:$0xff] %v452_v53 }
 0x22c   : > { %469 = vst [vmem:[%s1098_s23 + $0x58] sm:$0xff] %v453_v17  ;;  %470 = vst [vmem:[%s1098_s23 + $0x60] sm:$0xff] %v454_v22 }
 0x22d   : > { %471 = vst [vmem:[%s1098_s23 + $0x68] sm:$0xff] %v455_v18  ;;  %472 = vst [vmem:[%s1098_s23 + $0x70] sm:$0xff] %v456_v19 }
 0x22e   : > { %473 = vst [vmem:[%s1098_s23 + $0x78] sm:$0xff] %v457_v20 }
 0x22f   : > { %768 = shalt.err (!%p765_p2)
}
 0x230   : > { %s769_s29 = scalar_lea.hbm %s1123_s19, 2048  ;;  %s773_s10 = scalar_lea.hbm %s1182_s3, 4096 }
 0x231   : > { %p770_p4 = scmp.ne.s32.totalorder %s1123_s19, %s769_s29  ;;  %p774_p9 = scmp.lt.u32.totalorder %s1123_s19, %s1182_s3 }
 0x232   : > { %p775_p1 = scmp.lt.u32.totalorder %s773_s10, %s769_s29  ;;  %p777_p6 = scmp.lt.u32.totalorder %s769_s29, %s1123_s19 }
 0x233   : > { %p771_p5 = pnand %p770_p4, %p1189_p11 }
 0x234   : > { %p776_p3 = por %p775_p1, %p774_p9 }
 0x235   : > { %p772_p7 = pneg %p771_p5 }
 0x236   : > { %p778_p12 = por %p777_p6, %p776_p3 }
 0x238   : > { %p779_p13 = pnand %p778_p12, %p772_p7 }
 0x23a   : > { %782 = shalt.err (!%p779_p13)
}
 0x23b   : > { %s831_s7 = smov 128   ;;  %s832_s8 = smov 8  }
 0x23c   : > { %669 = dma.vmem_to_hbm [thread:$0]  (%p1189_p11), %s1125_s17, 2048, %s1123_s19, %s475_s20, %s831_s7, %s831_s7, %s832_s8  }
 0x23d PF: > { %s504_s23 = sand.u32 1, %s809_s12   ;;  %p1190_p8 = scmp.ne.s32.totalorder %s1187_s25, 0 }
 0x23e   : > { %p1191_p10 = scmp.ge.s32.totalorder %s821_s15, 2  ;;  %s505_s16 = scalar_lea.sflag [#allocation4], %s504_s23 }
 0x240   : > { %p676_p0 = pnand %p1191_p10, %p1190_p8 }
 0x242   : > { %804 = dma.done.wait (!%p676_p0), %s505_s16, 2048  }
 0x243   : > { %806 = vsyncadd (!%p676_p0), %s505_s16, 4294965248  ;;  %p16_p2 = scmp.ge.s32.totalorder %s878_s18, 4   ;;  %s1192_s12 = smov %s813_s13 }
 0x244   : > { %s1193_s13 = smov %s817_s14  ;;  %s1194_s14 = smov %s890_s21 }
 0x245   : > { %s1195_s15 = smov %s878_s18  ;;  %18 = sbr.rel (!%p16_p2) target bundleno = 5 (0x5), region = 77 }
 0x24c   :  { %510 = vsyncpa [#allocation3], 1 }
 0x24d   :  { %512 = vsyncpa [#allocation3 + $0x1], 1 }
 0x24e   :  { %513 = vsyncpa [#allocation4], 1 }
 0x24f   :  { %515 = vsyncpa [#allocation4 + $0x1], 1 }

</bundles_post_ra>
